<compile_context>
chip_gen: v6e
topology: v6e:2x2x1
jax: 0.10.0
libtpu: 0.0.40
codegen_flags: <defaults>
</compile_context>

<pallas_src>
import jax
import jax.numpy as jnp
from jax.experimental import pallas as pl
from jax.experimental.pallas import tpu as pltpu


def _add_one_kernel(x_ref, o_ref):
    # Elementwise hot path on the VPU; `1` is weakly typed so dtype is kept.
    o_ref[...] = x_ref[...] + 1


# Tiling constants.
_LANE = 128
_SUBLANE = 8
_TILE_COLS = 1024          # lane-dense width (multiple of 128)
_MAX_TILE_ROWS = 1024      # 1024x1024 f32 tile = 4 MiB -> fits v7x VMEM easily
_MIN_PALLAS_SIZE = 1024    # below this, pallas_call is pure overhead


def _round_up(n, m):
    return ((n + m - 1) // m) * m


def ky_forward(x):
    """Pallas equivalent of ky.forward: output = input + 1 (any shape/dtype)."""
    x = jnp.asarray(x)
    orig_shape = x.shape
    total = x.size

    # Short-circuit the scalar / tiny-tensor path (reference usage is 0-d).
    if total < _MIN_PALLAS_SIZE:
        return x + 1

    # Flatten into a lane-dense 2-D slab: cols = multiple of 128, rows padded
    # to a multiple of the row tile so every block is (8,128)-aligned.
    flat = x.reshape(-1)
    cols = min(_TILE_COLS, _round_up(total, _LANE))
    rows = pl.cdiv(total, cols)
    tile_rows = min(_MAX_TILE_ROWS, _round_up(rows, _SUBLANE))
    rows_p = _round_up(rows, tile_rows)

    pad = rows_p * cols - total
    if pad:
        flat = jnp.pad(flat, (0, pad))
    slab = flat.reshape(rows_p, cols)

    grid_rows = rows_p // tile_rows

    out = pl.pallas_call(
        _add_one_kernel,
        out_shape=jax.ShapeDtypeStruct((rows_p, cols), slab.dtype),
        grid=(grid_rows,),
        in_specs=[pl.BlockSpec((tile_rows, cols), lambda i: (i, 0))],
        out_specs=pl.BlockSpec((tile_rows, cols), lambda i: (i, 0)),
        input_output_aliases={0: 0},  # x+1 is safe in place; halves HBM footprint
        compiler_params=pltpu.CompilerParams(
            dimension_semantics=("parallel",)),
    )(slab)

    out = out.reshape(-1)
    if pad:
        out = out[:total]
    return out.reshape(orig_shape)


if __name__ == "__main__":
    key = jax.random.PRNGKey(0)
    k1, k2 = jax.random.split(key)

    # 0-d scalar, matching the PyTorch reference usage: x = torch.tensor(1.0).
    x0 = jnp.array(1.0, dtype=jnp.float32)
    y0 = ky_forward(x0)
    jax.block_until_ready(y0)
    assert y0.shape == x0.shape
    assert jnp.allclose(y0, x0 + 1.0)

    # Small 4-D tensor -> single lane-dense Pallas tile.
    x1 = jax.random.normal(k1, (2, 4, 16, 16), dtype=jnp.float32)
    y1 = ky_forward(x1)
    jax.block_until_ready(y1)
    assert y1.shape == x1.shape
    assert jnp.allclose(y1, x1 + 1.0)

    # Medium tensor -> multi-step tiled grid (exercises pipelining).
    x2 = jax.random.normal(k2, (1024, 2048), dtype=jnp.float32)
    y2 = ky_forward(x2)
    jax.block_until_ready(y2)
    assert y2.shape == x2.shape
    assert jnp.allclose(y2, x2 + 1.0)

    print("KERNEL_OK")
</pallas_src>

<mosaic_0001>
module attributes {stable_mosaic.version = 11 : i64} {
  func.func @_add_one_kernel(%arg0: i32, %arg1: memref<8x1024xf32, #tpu.memory_space<vmem>>, %arg2: memref<8x1024xf32, #tpu.memory_space<vmem>>) attributes {dimension_semantics = [#tpu.dimension_semantics<parallel>], iteration_bounds = array<i64: 1>, scalar_prefetch = 0 : i64, scratch_operands = 0 : i64, tpu.core_type = #tpu.core_type<tc>, window_params = [{transform_indices = @transform_0, window_bounds = array<i64: 8, 1024>}, {transform_indices = @transform_1, window_bounds = array<i64: 8, 1024>}]} {
    %c0 = arith.constant 0 : index
    %c0_0 = arith.constant 0 : index
    %0 = vector.load %arg1[%c0, %c0_0] : memref<8x1024xf32, #tpu.memory_space<vmem>>, vector<8x1024xf32>
    %cst = arith.constant 1.000000e+00 : f32
    %1 = vector.broadcast %cst : f32 to vector<8x1024xf32>
    %2 = arith.addf %0, %1 : vector<8x1024xf32>
    %c0_1 = arith.constant 0 : index
    %c0_2 = arith.constant 0 : index
    %3 = vector.load %arg2[%c0_1, %c0_2] : memref<8x1024xf32, #tpu.memory_space<vmem>>, vector<8x1024xf32>
    tpu.vector_store %arg2[%c0_1, %c0_2], %2 {strides = array<i32>} : memref<8x1024xf32, #tpu.memory_space<vmem>>, vector<8x1024xf32>,
    return
  }
  func.func @transform_0(%arg0: i32) -> (i32, i32) {
    %c0_i32 = arith.constant 0 : i32
    %c0_i32_0 = arith.constant 0 : i32
    return %arg0, %c0_i32 : i32, i32
  }
  func.func @transform_1(%arg0: i32) -> (i32, i32) {
    %c0_i32 = arith.constant 0 : i32
    %c0_i32_0 = arith.constant 0 : i32
    return %arg0, %c0_i32 : i32, i32
  }
}

</mosaic_0001>

<bundles_post_ra>
// kernel: tpu_custom_call.1
= control target key start
LH: loop header
LB: loop body
LE: loop exit
PB: predicated region body
PF: predicated region fallthrough
CT: control target
= control target key end

     0   :  { %6 = vsyncpa [#allocation3], 0  ;;  %s124_s0 = inlined_call_operand.hbm [shape: f32[8,1024], index: 0, kind: input, shape index: {}, may-alias: {0,1}]   ;;  %s125_s1 = inlined_call_operand.hbm [shape: f32[8,1024], index: 1, kind: output, shape index: {}, may-alias: {0,1}]  }
   0x1   :  { %7 = vsyncpa [#allocation4], 0  ;;  %s106_s6 = smov [#allocation2]  }
   0x2   :  { %s14_s7 = sshll.u32 %s106_s6, 4  ;;  %s15_s7 = int_to_ptr.vmem [resolvable:$true] %s14_s7 }
   0x3   :  { %s70_s8 = scalar_lea.vmem %s15_s7, 1024  ;;  %p75_p1 = scmp.lt.s32.totalorder %s15_s7, %s15_s7 }
   0x4   :  { %p71_p0 = scmp.ne.s32.totalorder %s15_s7, %s70_s8  ;;  %p76_p2 = scmp.lt.s32.totalorder %s70_s8, %s70_s8 }
   0x6   :  { %p77_p3 = por %p76_p2, %p75_p1 }
   0x8   :  { %p78_p4 = pnand %p77_p3, %p71_p0 }
   0xa   :  { %81 = shalt.err (!%p78_p4)
}
   0xb   :  { %17 = dma.hbm_to_vmem [thread:$0]  %s124_s0, 1024, %s15_s7, [#allocation3]  }
   0xc   :  { %102 = dma.done.wait [#allocation3], 1024  }
   0xd   :  { %103 = vsyncadd [#allocation3], 4294966272  ;;  %v21_v0 = vld [vmem:[#allocation2] sm:$0xff]  ;;  %v22_v1 = vld [vmem:[#allocation2 + $0x8] sm:$0xff]  ;;  %s107_s11 = smov [#allocation5]  }
   0xe   :  { %v23_v2 = vld [vmem:[#allocation2 + $0x10] sm:$0xff]  ;;  %s51_s12 = sshll.u32 %s107_s11, 4  ;;  %v29_v3 = vadd.f32 1.0, %v21_v0  ;;  %v30_v4 = vadd.f32 1.0, %v22_v1  ;;  %v24_v6 = vld [vmem:[#allocation2 + $0x18] sm:$0xff]  ;;  %v25_v7 = vld [vmem:[#allocation2 + $0x20] sm:$0xff]  ;;  %s52_s12 = int_to_ptr.vmem [resolvable:$true] %s51_s12 }
   0xf   :  { %v31_v5 = vadd.f32 1.0, %v23_v2  ;;  %v26_v8 = vld [vmem:[#allocation2 + $0x28] sm:$0xff]  ;;  %v32_v9 = vadd.f32 1.0, %v24_v6  ;;  %v33_v10 = vadd.f32 1.0, %v25_v7  ;;  %v27_v12 = vld [vmem:[#allocation2 + $0x30] sm:$0xff]  ;;  %v28_v13 = vld [vmem:[#allocation2 + $0x38] sm:$0xff]  ;;  %p87_p6 = scmp.lt.s32.totalorder %s52_s12, %s52_s12 }
  0x10   :  { %v34_v11 = vadd.f32 1.0, %v26_v8  ;;  %37 = vst [vmem:[#allocation5] sm:$0xff] %v29_v3  ;;  %38 = vst [vmem:[#allocation5 + $0x8] sm:$0xff] %v30_v4  ;;  %v35_v14 = vadd.f32 1.0, %v27_v12  ;;  %v36_v15 = vadd.f32 1.0, %v28_v13  ;;  %s82_s0 = scalar_lea.vmem %s52_s12, 1024 }
  0x11   :  { %39 = vst [vmem:[#allocation5 + $0x10] sm:$0xff] %v31_v5  ;;  %40 = vst [vmem:[#allocation5 + $0x18] sm:$0xff] %v32_v9  ;;  %p83_p5 = scmp.ne.s32.totalorder %s52_s12, %s82_s0  ;;  %p88_p7 = scmp.lt.s32.totalorder %s82_s0, %s82_s0 }
  0x12   :  { %41 = vst [vmem:[#allocation5 + $0x20] sm:$0xff] %v33_v10  ;;  %42 = vst [vmem:[#allocation5 + $0x28] sm:$0xff] %v34_v11 }
  0x13   :  { %43 = vst [vmem:[#allocation5 + $0x30] sm:$0xff] %v35_v14  ;;  %44 = vst [vmem:[#allocation5 + $0x38] sm:$0xff] %v36_v15  ;;  %p89_p8 = por %p88_p7, %p87_p6 }
  0x15   :  { %p90_p9 = pnand %p89_p8, %p83_p5 }
  0x17   :  { %93 = shalt.err (!%p90_p9)
}
  0x18   :  { %54 = dma.vmem_to_hbm [thread:$0]  %s52_s12, 1024, %s125_s1, [#allocation4]  }
  0x19   :  { %104 = dma.done.wait [#allocation4], 1024  }
  0x1a   :  { %105 = vsyncadd [#allocation4], 4294966272 }
  0x1b   :  { %58 = vsyncpa [#allocation3], 1 }
  0x1c   :  { %59 = vsyncpa [#allocation4], 1 }

</bundles_post_ra>
